<compile_context>
chip_gen: v7x
topology: tpu7x:2x2x1
jax: 0.10.0
libtpu: 0.0.40
codegen_flags: <defaults>
</compile_context>

<pallas_src>
import jax
import jax.numpy as jnp
from jax.experimental import pallas as pl
from jax.experimental.pallas import tpu as pltpu


def _attention_kernel(h_ref, w_ref, o_ref):
    # h_ref: (TB, S, H)  batch tile of hidden states
    # w_ref: (1, H)      attention weight vector (lane-dense row)
    # o_ref: (TB, H)     output tile (sublane = batch, lane = hidden)
    h = h_ref[...].astype(jnp.float32)                 # (TB, S, H), single VMEM read
    w = w_ref[...].astype(jnp.float32)                 # (1, H) -> broadcasts over (TB, S, H)

    # scores[b, s] = sum_h hidden[b, s, h] * att_w[h]   (VPU mul + XLU lane reduce)
    scores = jnp.sum(h * w, axis=-1)                   # (TB, S)

    # Numerically-stable softmax over the sequence axis; division deferred.
    m = jnp.max(scores, axis=-1, keepdims=True)        # (TB, 1)
    e = jnp.exp(scores - m)                            # (TB, S)   EUP
    denom = jnp.sum(e, axis=-1, keepdims=True)         # (TB, 1)

    # Unnormalized weighted sum over seq, then a single (TB, H) scale by 1/denom.
    acc = jnp.sum(h * e[:, :, None], axis=1)           # (TB, H)
    out = acc * pl.reciprocal(denom, approx=False)     # exact: matches reference tol
    o_ref[...] = out.astype(o_ref.dtype)


def attention_forward(hidden, att_weights, *, block_b=None,
                      vmem_limit_bytes=64 * 1024 * 1024):
    """hidden: (B, S, H); att_weights: (H, 1)  ->  (B, H)."""
    B, S, H = hidden.shape
    w_row = att_weights.reshape(1, H)                  # lane-dense weight row

    if block_b is None:
        # ~8 MiB per input block; with double buffering this stays well inside
        # the scoped-VMEM limit on v5e/v6e and the 64 MiB VMEM of v7x.
        budget = 8 * 1024 * 1024
        per_row = S * H * hidden.dtype.itemsize
        tb = max(1, budget // per_row)
        if tb >= B:
            block_b = B                                # whole batch in one block
        else:
            block_b = max(8, (tb // 8) * 8)            # sublane-dense output stores

    # Pad batch to a multiple of block_b (padded rows are zeros: softmax over
    # zero scores is uniform, weighted sum of zeros is zero; sliced away below).
    b_pad = pl.cdiv(B, block_b) * block_b
    if b_pad != B:
        hidden = jnp.pad(hidden, ((0, b_pad - B), (0, 0), (0, 0)))

    # TODO(synk): for very large S*H where even a (block_b=1, S, H) slab cannot
    # fit in VMEM, add a second "arbitrary" grid axis over S with an
    # online-softmax (m, l, acc) accumulator in VMEM scratch.
    out = pl.pallas_call(
        _attention_kernel,
        out_shape=jax.ShapeDtypeStruct((b_pad, H), hidden.dtype),
        grid_spec=pltpu.PrefetchScalarGridSpec(
            num_scalar_prefetch=0,
            grid=(b_pad // block_b,),
            in_specs=[
                pl.BlockSpec((block_b, S, H), lambda b: (b, 0, 0)),
                pl.BlockSpec((1, H), lambda b: (0, 0)),
            ],
            out_specs=pl.BlockSpec((block_b, H), lambda b: (b, 0)),
        ),
        compiler_params=pltpu.CompilerParams(
            dimension_semantics=("parallel",),
            vmem_limit_bytes=vmem_limit_bytes,
        ),
    )(hidden, w_row)
    return out[:B]


def attention_reference(hidden, att_weights):
    scores = jnp.einsum("bsh,ho->bso", hidden, att_weights)[..., 0]  # (B, S)
    weights = jax.nn.softmax(scores, axis=1)                         # (B, S)
    return jnp.sum(hidden * weights[..., None], axis=1)              # (B, H)


if __name__ == "__main__":
    B, S, H = 2, 8, 32
    key = jax.random.PRNGKey(0)
    k_h, k_w = jax.random.split(key)

    hidden = jax.random.normal(k_h, (B, S, H), dtype=jnp.float32)
    # nn.init.uniform_(att_weights, -0.1, 0.1), shape (H, 1)
    att_weights = jax.random.uniform(
        k_w, (H, 1), dtype=jnp.float32, minval=-0.1, maxval=0.1
    )

    out = attention_forward(hidden, att_weights)
    out = jax.block_until_ready(out)

    ref = attention_reference(hidden, att_weights)
    assert out.shape == (B, H)
    assert jnp.allclose(out, ref, atol=1e-5, rtol=1e-5), "mismatch vs reference"

    print("KERNEL_OK")
</pallas_src>

<mosaic_0001>
module attributes {stable_mosaic.version = 11 : i64} {
  func.func @_attention_kernel(%arg0: i32, %arg1: memref<2x8x32xf32, #tpu.memory_space<vmem>>, %arg2: memref<1x32xf32, #tpu.memory_space<vmem>>, %arg3: memref<2x32xf32, #tpu.memory_space<vmem>>) attributes {dimension_semantics = [#tpu.dimension_semantics<parallel>], iteration_bounds = array<i64: 1>, scalar_prefetch = 0 : i64, scratch_operands = 0 : i64, tpu.core_type = #tpu.core_type<tc>, window_params = [{transform_indices = @transform_0, window_bounds = array<i64: 2, 8, 32>}, {pipeline_mode = #tpu.pipeline_mode<synchronous>, transform_indices = @transform_1, window_bounds = array<i64: 1, 32>}, {transform_indices = @transform_2, window_bounds = array<i64: 2, 32>}]} {
    %c0 = arith.constant 0 : index
    %c0_0 = arith.constant 0 : index
    %c0_1 = arith.constant 0 : index
    %0 = vector.load %arg1[%c0, %c0_0, %c0_1] : memref<2x8x32xf32, #tpu.memory_space<vmem>>, vector<2x8x32xf32>
    %c0_2 = arith.constant 0 : index
    %c0_3 = arith.constant 0 : index
    %1 = vector.load %arg2[%c0_2, %c0_3] : memref<1x32xf32, #tpu.memory_space<vmem>>, vector<1x32xf32>
    %2 = vector.shape_cast %1 : vector<1x32xf32> to vector<1x1x32xf32>
    %3 = vector.broadcast %2 : vector<1x1x32xf32> to vector<2x8x32xf32>
    %4 = arith.mulf %0, %3 : vector<2x8x32xf32>
    %cst = arith.constant dense<0.000000e+00> : vector<2x8xf32>
    %5 = vector.multi_reduction <add>, %4, %cst [2] : vector<2x8x32xf32> to vector<2x8xf32>
    %cst_4 = arith.constant dense<0xFF800000> : vector<2xf32>
    %6 = vector.multi_reduction <maximumf>, %5, %cst_4 [1] : vector<2x8xf32> to vector<2xf32>
    %7 = vector.shape_cast %6 : vector<2xf32> to vector<2x1xf32>
    %8 = vector.broadcast %7 : vector<2x1xf32> to vector<2x8xf32>
    %9 = arith.subf %5, %8 : vector<2x8xf32>
    %10 = math.exp %9 : vector<2x8xf32>
    %cst_5 = arith.constant dense<0.000000e+00> : vector<2xf32>
    %11 = vector.multi_reduction <add>, %10, %cst_5 [1] : vector<2x8xf32> to vector<2xf32>
    %12 = vector.shape_cast %11 : vector<2xf32> to vector<2x1xf32>
    %13 = vector.shape_cast %10 : vector<2x8xf32> to vector<2x8x1xf32>
    %14 = vector.broadcast %13 : vector<2x8x1xf32> to vector<2x8x32xf32>
    %15 = arith.mulf %0, %14 : vector<2x8x32xf32>
    %cst_6 = arith.constant dense<0.000000e+00> : vector<2x32xf32>
    %16 = vector.multi_reduction <add>, %15, %cst_6 [1] : vector<2x8x32xf32> to vector<2x32xf32>
    %17 = tpu.reciprocal %12 : vector<2x1xf32> -> vector<2x1xf32>
    %18 = vector.broadcast %17 : vector<2x1xf32> to vector<2x32xf32>
    %19 = arith.mulf %16, %18 : vector<2x32xf32>
    %c0_7 = arith.constant 0 : index
    %c0_8 = arith.constant 0 : index
    %20 = vector.load %arg3[%c0_7, %c0_8] : memref<2x32xf32, #tpu.memory_space<vmem>>, vector<2x32xf32>
    tpu.vector_store %arg3[%c0_7, %c0_8], %19 {strides = array<i32>} : memref<2x32xf32, #tpu.memory_space<vmem>>, vector<2x32xf32>,
    return
  }
  func.func @transform_0(%arg0: i32) -> (i32, i32, i32) {
    %c0_i32 = arith.constant 0 : i32
    %c0_i32_0 = arith.constant 0 : i32
    %c0_i32_1 = arith.constant 0 : i32
    return %arg0, %c0_i32, %c0_i32_0 : i32, i32, i32
  }
  func.func @transform_1(%arg0: i32) -> (i32, i32) {
    %c0_i32 = arith.constant 0 : i32
    %c0_i32_0 = arith.constant 0 : i32
    %c0_i32_1 = arith.constant 0 : i32
    return %c0_i32, %c0_i32_0 : i32, i32
  }
  func.func @transform_2(%arg0: i32) -> (i32, i32) {
    %c0_i32 = arith.constant 0 : i32
    %c0_i32_0 = arith.constant 0 : i32
    return %arg0, %c0_i32 : i32, i32
  }
}

</mosaic_0001>

<bundles_post_ra>
// kernel: tpu_custom_call.1
= control target key start
LH: loop header
LB: loop body
LE: loop exit
PB: predicated region body
PF: predicated region fallthrough
CT: control target
= control target key end

     0   :  { %7 = vsyncpa [#allocation3], 0  ;;  %s314_s0 = inlined_call_operand.hbm [shape: f32[2,8,32], index: 0, kind: input, shape index: {}]   ;;  %s315_s1 = inlined_call_operand.hbm [shape: f32[1,32], index: 1, kind: input, shape index: {}]   ;;  %s316_s2 = inlined_call_operand.hbm [shape: f32[2,32], index: 2, kind: output, shape index: {}]  }
   0x1   :  { %8 = vsyncpa [#allocation6], 0 }
   0x2   :  { %9 = vsyncpa [#allocation4], 0  ;;  %s248_s9 = smov [#allocation2]   ;;  %s176_s13 = scalar_lea.hbm %s314_s0, 256 }
   0x3   :  { %s15_s10 = sshll.u32 %s248_s9, 4  ;;  %p177_p0 = scmp.ne.s32.totalorder %s314_s0, %s176_s13  ;;  %s16_s10 = int_to_ptr.vmem [resolvable:$true] %s15_s10 }
   0x4   :  { %p180_p1 = scmp.lt.u32.totalorder %s176_s13, %s314_s0 }
   0x6   :  { %p182_p2 = pnand %p180_p1, %p177_p0 }
   0x8   :  { %185 = shalt.err (!%p182_p2)
}
   0x9   :  { %s186_s18 = scalar_lea.vmem %s16_s10, 256  ;;  %p191_p4 = scmp.lt.s32.totalorder %s16_s10, %s16_s10 }
   0xa   :  { %p187_p3 = scmp.ne.s32.totalorder %s16_s10, %s186_s18  ;;  %p192_p5 = scmp.lt.s32.totalorder %s186_s18, %s186_s18 }
   0xc   :  { %p193_p6 = por %p192_p5, %p191_p4 }
   0xe   :  { %p194_p7 = pnand %p193_p6, %p187_p3 }
  0x10   :  { %197 = shalt.err (!%p194_p7)
}
  0x11   :  { %s249_s19 = smov 128   ;;  %s250_s20 = smov 8  }
  0x12   :  { %21 = dma.hbm_to_vmem [thread:$0]  %s314_s0, 256, %s16_s10, [#allocation3], %s249_s19, %s249_s19, %s250_s20  }
  0x13   :  { %s251_s23 = smov [#allocation5]   ;;  %s198_s27 = scalar_lea.hbm %s315_s1, 16 }
  0x14   :  { %s28_s24 = sshll.u32 %s251_s23, 4  ;;  %p199_p8 = scmp.ne.s32.totalorder %s315_s1, %s198_s27  ;;  %s29_s24 = int_to_ptr.vmem [resolvable:$true] %s28_s24 }
  0x15   :  { %p202_p9 = scmp.lt.u32.totalorder %s198_s27, %s315_s1 }
  0x17   :  { %p204_p10 = pnand %p202_p9, %p199_p8 }
  0x19   :  { %207 = shalt.err (!%p204_p10)
}
  0x1a   :  { %s208_s4 = scalar_lea.vmem %s29_s24, 16  ;;  %s212_s0 = scalar_lea.vmem %s29_s24, 32 }
  0x1b   :  { %p209_p11 = scmp.ne.s32.totalorder %s29_s24, %s208_s4  ;;  %p213_p12 = scmp.lt.s32.totalorder %s29_s24, %s29_s24 }
  0x1c   :  { %p214_p13 = scmp.lt.s32.totalorder %s212_s0, %s208_s4 }
  0x1e   :  { %p215_p0 = por %p214_p13, %p213_p12 }
  0x20   :  { %p216_p1 = pnand %p215_p0, %p209_p11 }
  0x22   :  { %219 = shalt.err (!%p216_p1)
}
  0x23   :  { %31 = dma.hbm_to_vmem [thread:$0]  %s315_s1, 16, %s29_s24, [#allocation6]  }
  0x24   :  { %242 = dma.done.wait [#allocation3], 256  }
  0x25   :  { %243 = vsyncadd [#allocation3], 4294967040 }
  0x26   :  { %244 = dma.done.wait [#allocation6], 16  }
  0x27   :  { %245 = vsyncadd [#allocation6], 4294967280  ;;  %v38_v0 = vld [vmem:[#allocation2] sm:$0xff]  ;;  %v161_v1 = vld [vmem:[#allocation5] ss:$0 sm:$0xff]  ;;  %vm49_vm0 = vcmask 261120   ;;  %v58_v7 = vlaneseq }
  0x28   :  { %v39_v2 = vld [vmem:[#allocation2 + $0x8] sm:$0xff]  ;;  %v47_v3 = vmul.f32 %v161_v1, %v38_v0  ;;  %vm68_vm1 = vcmask 1041409   ;;  %vm71_vm2 = vcmask 58368   ;;  %v252_v17 = vmov 0   ;;  %s253_s1 = smov [#allocation7]  }
  0x29   :  { %v48_v4 = vmul.f32 %v161_v1, %v39_v2  ;;  %v59_v8 = vand.u32 127, %v58_v7  ;;  %v61_v9 = vshrl.u32 %v58_v7, 7  ;;  %169 = vset.pattern.permute.xlu0 %v252_v17  ;;  %168 = vset.pattern.permute.xlu1 %v252_v17  ;;  %s151_s7 = sshll.u32 %s253_s1, 4  ;;  %vm143_vm3 = vcmask 254976   ;;  %s152_s7 = int_to_ptr.vmem [resolvable:$true] %s151_s7 }
  0x2a   :  { %v50_v5 = vsel %vm49_vm0, %v47_v3, 0.0  ;;  %s220_s8 = scalar_lea.vmem %s152_s7, 32  ;;  %p225_p3 = scmp.lt.s32.totalorder %s152_s7, %s152_s7 }
  0x2b   :  { %51 = vadd.xlane.f32.xlu0 %v50_v5  ;;  %v53_v6 = vsel %vm49_vm0, %v48_v4, 0.0  ;;  %v62_v11 = vsub.s32 %v59_v8, %v61_v9  ;;  %v78_v18 = vsub.s32 0, %v61_v9  ;;  %v82_v19 = vsub.s32 1, %v61_v9  ;;  %p221_p2 = scmp.ne.s32.totalorder %s152_s7, %s220_s8  ;;  %p226_p4 = scmp.lt.s32.totalorder %s220_s8, %s220_s8 }
  0x2d   :  { %p227_p5 = por %p226_p4, %p225_p3 }
  0x2f   :  { %54 = vadd.xlane.f32.xlu0 %v53_v6  ;;  %p228_p6 = pnand %p227_p5, %p221_p2 }
  0xb8   :  { %v52_v10 = vpop.xlane.xlu0 %51 }
  0xb9   :  { %v63_v13 = vrot.slane %v52_v10, %v62_v11 }
  0xbc   :  { %v55_v12 = vpop.xlane.xlu0 %54 }
  0xbd   :  { %v67_v14 = vrot.slane %v55_v12, %v62_v11 }
  0xbf   :  { %v69_v15 = vsel %vm68_vm1, %v67_v14, %v63_v13 }
  0xc0   :  { %v72_v16 = vsel %vm71_vm2, %v69_v15, -inf }
  0xc1   :  { %73 = vmax.xlane.f32.xlu1 %v72_v16 }
 0x14e   :  { %v74_v20 = vpop.xlane.xlu1 %73 }
 0x14f   :  { %v79_v21 = vrot.slane %v74_v20, %v78_v18  ;;  %v83_v22 = vrot.slane %v74_v20, %v82_v19 }
 0x151   :  { %v86_v23 = vsub.f32 %v52_v10, %v79_v21  ;;  %v87_v24 = vsub.f32 %v55_v12, %v83_v22 }
 0x153   :  { %v88_v25 = vmul.f32 1.442695, %v86_v23  ;;  %v90_v26 = vmul.f32 1.442695, %v87_v24 }
 0x155   :  { %170 = vpow2.f32 %v88_v25 }
 0x156   :  { %172 = vpow2.f32 %v90_v26 }
 0x15f   :  { %v171_v27 = vpop.eup %170 }
 0x160   :  { %v173_v28 = vpop.eup %172  ;;  %95 = vperm.xlu1 %168, %v171_v27  }
 0x161   :  { %98 = vperm.xlu0 %169, %v173_v28  }
 0x1df   :  { %v96_v29 = vpop.permute.xlu1 %95 }
 0x1e0   :  { %v99_v30 = vpop.permute.xlu0 %98  ;;  %v103_v31 = vrot.slane %v96_v29, %v62_v11  ;;  %v115_v36 = vmul.f32 %v96_v29, %v38_v0 }
 0x1e1   :  { %v107_v32 = vrot.slane %v99_v30, %v62_v11  ;;  %v116_v35 = vmul.f32 %v99_v30, %v39_v2 }
 0x1e2   :  { %v117_v38 = vsel %vm49_vm0, %v115_v36, 0.0 }
 0x1e3   :  { %v108_v33 = vsel %vm68_vm1, %v107_v32, %v103_v31  ;;  %v124_v37 = vsel %vm49_vm0, %v116_v35, 0.0  ;;  %v118_v40 = vrot.slane %v117_v38, 4 }
 0x1e4   :  { %v110_v34 = vsel %vm71_vm2, %v108_v33, 0.0  ;;  %v125_v39 = vrot.slane %v124_v37, 4 }
 0x1e5   :  { %111 = vadd.xlane.f32.xlu1 %v110_v34  ;;  %v119_v42 = vadd.f32 %v118_v40, %v117_v38 }
 0x1e6   :  { %v126_v41 = vadd.f32 %v125_v39, %v124_v37 }
 0x1e7   :  { %v120_v45 = vrot.slane %v119_v42, 2 }
 0x1e8   :  { %v127_v43 = vrot.slane %v126_v41, 2 }
 0x1e9   :  { %v121_v47 = vadd.f32 %v120_v45, %v119_v42 }
 0x1ea   :  { %v128_v46 = vadd.f32 %v127_v43, %v126_v41 }
 0x1eb   :  { %v122_v49 = vrot.slane %v121_v47, 1 }
 0x1ec   :  { %v129_v48 = vrot.slane %v128_v46, 1 }
 0x1ed   :  { %v123_v53 = vadd.f32 %v122_v49, %v121_v47 }
 0x1ee   :  { %v130_v51 = vadd.f32 %v129_v48, %v128_v46 }
 0x272   :  { %v112_v44 = vpop.xlane.xlu1 %111 }
 0x273   :  { %174 = vrcp.f32 %v112_v44 }
 0x27d   :  { %v175_v50 = vpop.eup %174 }
 0x27e   :  { %v133_v52 = vrot.slane %v175_v50, 1  ;;  %v136_v55 = vmul.f32 %v175_v50, %v123_v53 }
 0x280   :  { %v137_v54 = vmul.f32 %v133_v52, %v130_v51 }
 0x282   :  { %v140_v56 = vrot.slane %v137_v54, 7 }
 0x284   :  { %v141_v57 = vsel %vm68_vm1, %v140_v56, %v136_v55 }
 0x285   :  { %144 = vst.msk [vmem:[#allocation7] sm:$0x3] %vm143_vm3, %v141_v57 }
 0x286   :  { %231 = shalt.err (!%p228_p6)
}
 0x287   :  { %s232_s11 = scalar_lea.hbm %s316_s2, 32 }
 0x288   :  { %p233_p7 = scmp.ne.s32.totalorder %s316_s2, %s232_s11  ;;  %p236_p8 = scmp.lt.u32.totalorder %s232_s11, %s316_s2 }
 0x28a   :  { %p238_p9 = pnand %p236_p8, %p233_p7 }
 0x28c   :  { %241 = shalt.err (!%p238_p9)
}
 0x28d   :  { %154 = dma.vmem_to_hbm [thread:$0]  %s152_s7, 32, %s316_s2, [#allocation4]  }
 0x28e   :  { %246 = dma.done.wait [#allocation4], 32  }
 0x28f   :  { %247 = vsyncadd [#allocation4], 4294967264 }
 0x290   :  { %158 = vsyncpa [#allocation3], 1 }
 0x291   :  { %159 = vsyncpa [#allocation6], 1 }
 0x292   :  { %160 = vsyncpa [#allocation4], 1 }

</bundles_post_ra>
